<compile_context>
chip_gen: v5e
topology: v5e:2x2
jax: 0.10.0
libtpu: 0.0.40
codegen_flags: <defaults>
</compile_context>

<pallas_src>
import jax
import jax.numpy as jnp
from jax import lax
from jax.experimental import pallas as pl
from jax.experimental.pallas import tpu as pltpu

# Deterministic de-normalization constants (synthetic, fixed in-script).
REV_STD = 2.0
REV_MEAN = 0.5

LANE_CHOICES = (512, 256, 128)     # lane-dense widths (multiples of 128)
BLOCK_ELEMS_TARGET = 1 << 20       # ~1M elems -> 4 MiB per f32 input block


def _round_up(x, m):
    return ((x + m - 1) // m) * m


def _round_down(x, m):
    return (x // m) * m


def _make_kernel(tm, lanes, sub, rows_total):
    """Build a partial-|diff|-sum kernel for one (tm, lanes) block.

    Writes an (1, 8, 128) f32 partial-sum slab per grid step.  `sub` is the
    row-chunk granularity (8 for 32-bit dtypes, 16 for bf16, ...).  If the last
    grid block is ragged (rows_total % tm != 0) the out-of-range rows are
    masked with an iota compare (their VMEM contents are unspecified).
    """
    mask_last = (rows_total % tm) != 0
    n_chunks = tm // sub                      # sub-row chunks per block
    group = max(1, 64 // sub)                 # chunks per fori_loop iteration (~64 rows)

    def kernel(x_ref, t_ref, out_ref):
        if mask_last:
            base = pl.program_id(0) * tm
            row_iota = lax.broadcasted_iota(jnp.int32, (sub, lanes), 0)

        def add_chunk(r, acc):
            # r: local row offset, multiple of `sub` (static or dynamic).
            x = x_ref[pl.ds(r, sub), :].astype(jnp.float32) * REV_STD + REV_MEAN
            t = t_ref[pl.ds(r, sub), :].astype(jnp.float32)
            d = jnp.abs(x - t)                                    # (sub, lanes)
            if mask_last:
                d = jnp.where(base + r + row_iota < rows_total, d, 0.0)
            for j in range(sub // 8):                             # fold to (8, lanes)
                acc = acc + d[j * 8:(j + 1) * 8, :]
            return acc

        acc = jnp.zeros((8, lanes), jnp.float32)
        if n_chunks <= group:
            # Small block: fully static unroll.
            for c in range(n_chunks):
                acc = add_chunk(c * sub, acc)
        else:
            n_groups = n_chunks // group
            def body(g, a):
                r0 = pl.multiple_of(g * (group * sub), sub)
                for j in range(group):
                    a = add_chunk(r0 + j * sub, a)
                return a
            acc = lax.fori_loop(0, n_groups, body, acc)
            for c in range(n_groups * group, n_chunks):           # leftover chunks
                acc = add_chunk(c * sub, acc)

        # Lane-group fold with vreg-aligned 128-wide static slices (VPU adds).
        part = acc[:, 0:128]
        for k in range(1, lanes // 128):
            part = part + acc[:, k * 128:(k + 1) * 128]
        out_ref[...] = part.reshape(1, 8, 128)

    return kernel


def mae_loss(inp, tgt):
    """inp, tgt: (B, C, H, W) -> scalar float32 (reduction='mean')."""
    assert inp.shape == tgt.shape
    total = 1
    for s in inp.shape:
        total *= s

    x_flat = jnp.reshape(inp, (-1,))
    t_flat = jnp.reshape(tgt, (-1,))

    itemsize_x = jnp.dtype(inp.dtype).itemsize
    itemsize_t = jnp.dtype(tgt.dtype).itemsize
    # Row-chunk granularity matching the native sublane tile: 8 (f32), 16 (bf16), 32 (i8).
    sub = (8 * 4) // min(itemsize_x, itemsize_t, 4)

    def _jnp_sum(xs, ts):
        xs = xs.astype(jnp.float32) * REV_STD + REV_MEAN
        return jnp.sum(jnp.abs(xs - ts.astype(jnp.float32)))

    # Pick the widest lane count that divides `total` -> zero-copy reshape.
    lanes = next((w for w in LANE_CHOICES if total % w == 0), None)
    if lanes is None:
        # Rare: total not a multiple of 128.  The kernel handles the
        # 128-aligned prefix; the (<128-elem) remainder is folded in with jnp.
        lanes = 128
        bulk = _round_down(total, 128)
        tail_sum = _jnp_sum(x_flat[bulk:], t_flat[bulk:])
    else:
        bulk = total
        tail_sum = jnp.float32(0.0)

    rows = bulk // lanes
    if rows < sub:
        # Tiny input: not worth a kernel launch.
        return (_jnp_sum(x_flat, t_flat) / total).astype(jnp.float32)

    if bulk != total:
        x_flat = x_flat[:bulk]
        t_flat = t_flat[:bulk]
    x2 = x_flat.reshape(rows, lanes)
    t2 = t_flat.reshape(rows, lanes)

    # Block rows: ~4 MiB per f32 input block, but always >= 2 grid blocks when
    # rows allow it so v7x megacore ("parallel") gives both TensorCores work.
    tm_cap = max(sub, _round_down(BLOCK_ELEMS_TARGET // lanes, sub))
    half = _round_up(pl.cdiv(rows, 2), sub)       # half <= rows for rows >= sub
    tm = min(tm_cap, half)
    num_blocks = pl.cdiv(rows, tm)

    kernel = _make_kernel(tm, lanes, sub, rows)

    partials = pl.pallas_call(
        kernel,
        out_shape=jax.ShapeDtypeStruct((num_blocks, 8, 128), jnp.float32),
        grid_spec=pltpu.PrefetchScalarGridSpec(
            num_scalar_prefetch=0,
            grid=(num_blocks,),
            in_specs=[
                pl.BlockSpec((tm, lanes), lambda i: (i, 0)),
                pl.BlockSpec((tm, lanes), lambda i: (i, 0)),
            ],
            out_specs=pl.BlockSpec((1, 8, 128), lambda i: (i, 0, 0)),
        ),
        compiler_params=pltpu.CompilerParams(
            # Independent per-block partials -> megacore-friendly on v7x.
            dimension_semantics=("parallel",),
            # 2 inputs x 2 buffers x <=4 MiB = <=16 MiB; raise v5e's 16 MiB
            # default scoped limit explicitly (well within physical VMEM on
            # v5e/v6e/v7x).
            vmem_limit_bytes=32 * 1024 * 1024,
        ),
        cost_estimate=pl.CostEstimate(
            flops=4 * bulk,
            transcendentals=0,
            bytes_accessed=bulk * (itemsize_x + itemsize_t)
                           + num_blocks * 8 * 128 * 4,
        ),
    )(x2, t2)

    total_sum = jnp.sum(partials) + tail_sum
    # mean of per-sample means == global mean (identical per-sample counts).
    return total_sum * jnp.float32(1.0 / total)


def mae_loss_ref(inp, tgt):
    """Pure-JAX reference mirroring the PyTorch per-sample loop + mean."""
    x = inp.astype(jnp.float32) * REV_STD + REV_MEAN
    per_sample = jnp.mean(jnp.abs(x - tgt.astype(jnp.float32)), axis=(1, 2, 3))
    return jnp.mean(per_sample)


if __name__ == "__main__":
    key = jax.random.PRNGKey(0)
    k1, k2 = jax.random.split(key)
    B, C, H, W = 2, 4, 32, 32   # 8192 elems -> 16 lane-dense rows -> 2 grid blocks
    inp = jax.random.normal(k1, (B, C, H, W), dtype=jnp.float32)
    tgt = jax.random.normal(k2, (B, C, H, W), dtype=jnp.float32)

    out = mae_loss(inp, tgt)
    out = jax.block_until_ready(out)

    ref = mae_loss_ref(inp, tgt)
    assert jnp.allclose(out, ref, rtol=1e-5, atol=1e-5), (out, ref)
    print("KERNEL_OK")
</pallas_src>

<mosaic_0001>
module attributes {stable_mosaic.version = 11 : i64} {
  func.func @kernel(%arg0: i32, %arg1: memref<8x512xf32, #tpu.memory_space<vmem>>, %arg2: memref<8x512xf32, #tpu.memory_space<vmem>>, %arg3: memref<1x8x128xf32, #tpu.memory_space<vmem>>) attributes {dimension_semantics = [#tpu.dimension_semantics<parallel>], iteration_bounds = array<i64: 2>, scalar_prefetch = 0 : i64, scratch_operands = 0 : i64, tpu.core_type = #tpu.core_type<tc>, window_params = [{transform_indices = @transform_0, window_bounds = array<i64: 8, 512>}, {transform_indices = @transform_1, window_bounds = array<i64: 8, 512>}, {transform_indices = @transform_2, window_bounds = array<i64: 1, 8, 128>}]} {
    %cst = arith.constant 0.000000e+00 : f32
    %0 = vector.broadcast %cst : f32 to vector<8x512xf32>
    %c0 = arith.constant 0 : index
    %c0_0 = arith.constant 0 : index
    %1 = vector.load %arg1[%c0, %c0_0] : memref<8x512xf32, #tpu.memory_space<vmem>>, vector<8x512xf32>
    %cst_1 = arith.constant 2.000000e+00 : f32
    %2 = vector.broadcast %cst_1 : f32 to vector<8x512xf32>
    %3 = arith.mulf %1, %2 : vector<8x512xf32>
    %cst_2 = arith.constant 5.000000e-01 : f32
    %4 = vector.broadcast %cst_2 : f32 to vector<8x512xf32>
    %5 = arith.addf %3, %4 : vector<8x512xf32>
    %c0_3 = arith.constant 0 : index
    %c0_4 = arith.constant 0 : index
    %6 = vector.load %arg2[%c0_3, %c0_4] : memref<8x512xf32, #tpu.memory_space<vmem>>, vector<8x512xf32>
    %7 = arith.subf %5, %6 : vector<8x512xf32>
    %8 = math.absf %7 : vector<8x512xf32>
    %9 = arith.addf %0, %8 : vector<8x512xf32>
    %10 = vector.extract_strided_slice %9 {offsets = [0, 0], sizes = [8, 128], strides = [1, 1]} : vector<8x512xf32> to vector<8x128xf32>
    %11 = vector.extract_strided_slice %9 {offsets = [0, 128], sizes = [8, 128], strides = [1, 1]} : vector<8x512xf32> to vector<8x128xf32>
    %12 = arith.addf %10, %11 : vector<8x128xf32>
    %13 = vector.extract_strided_slice %9 {offsets = [0, 256], sizes = [8, 128], strides = [1, 1]} : vector<8x512xf32> to vector<8x128xf32>
    %14 = arith.addf %12, %13 : vector<8x128xf32>
    %15 = vector.extract_strided_slice %9 {offsets = [0, 384], sizes = [8, 128], strides = [1, 1]} : vector<8x512xf32> to vector<8x128xf32>
    %16 = arith.addf %14, %15 : vector<8x128xf32>
    %17 = vector.shape_cast %16 : vector<8x128xf32> to vector<1x8x128xf32>
    %c0_5 = arith.constant 0 : index
    %c0_6 = arith.constant 0 : index
    %c0_7 = arith.constant 0 : index
    %18 = vector.load %arg3[%c0_5, %c0_6, %c0_7] : memref<1x8x128xf32, #tpu.memory_space<vmem>>, vector<1x8x128xf32>
    tpu.vector_store %arg3[%c0_5, %c0_6, %c0_7], %17 {strides = array<i32>} : memref<1x8x128xf32, #tpu.memory_space<vmem>>, vector<1x8x128xf32>,
    return
  }
  func.func @transform_0(%arg0: i32) -> (i32, i32) {
    %c0_i32 = arith.constant 0 : i32
    %c0_i32_0 = arith.constant 0 : i32
    return %arg0, %c0_i32 : i32, i32
  }
  func.func @transform_1(%arg0: i32) -> (i32, i32) {
    %c0_i32 = arith.constant 0 : i32
    %c0_i32_0 = arith.constant 0 : i32
    return %arg0, %c0_i32 : i32, i32
  }
  func.func @transform_2(%arg0: i32) -> (i32, i32, i32) {
    %c0_i32 = arith.constant 0 : i32
    %c0_i32_0 = arith.constant 0 : i32
    %c0_i32_1 = arith.constant 0 : i32
    return %arg0, %c0_i32, %c0_i32_0 : i32, i32, i32
  }
}

</mosaic_0001>

<bundles_post_ra>
// kernel: tpu_custom_call.1
= control target key start
LH: loop header
LB: loop body
LE: loop exit
PB: predicated region body
PF: predicated region fallthrough
CT: control target
= control target key end

     0   :  { %7 = vsyncpa [#allocation3], 0  ;;  %s721_s0 = inlined_call_operand.hbm [shape: f32[16,512], index: 0, kind: input, shape index: {}]   ;;  %s722_s1 = inlined_call_operand.hbm [shape: f32[16,512], index: 1, kind: input, shape index: {}]   ;;  %s723_s2 = inlined_call_operand.hbm [shape: f32[2,8,128], index: 2, kind: output, shape index: {}]  }
   0x1   :  { %9 = vsyncpa [#allocation3 + $0x1], 0 }
   0x2   :  { %10 = vsyncpa [#allocation6], 0 }
   0x3   :  { %12 = vsyncpa [#allocation6 + $0x1], 0 }
   0x4   :  { %13 = vsyncpa [#allocation4], 0 }
   0x5   :  { %15 = vsyncpa [#allocation4 + $0x1], 0  ;;  %s560_s9 = smov 0   ;;  %s562_s10 = smov 0  }
   0x6   :  { %s564_s11 = smov 0   ;;  %s566_s12 = smov 0  }
   0x7 LB: > { %s581_s13 = sadd.s32 4294967295, %s543_s12   ;;  %s343_s14 = sadd.s32 4294967294, %s543_s12   ;;  %s543_s12 = sphi %s566_s12, %s734_s12   ;;  %s539_s11 = sphi %s564_s11, %s733_s11   ;;  %s535_s10 = sphi %s562_s10, %s732_s10   ;;  %s531_s9 = sphi %s560_s9, %s731_s9  }
   0x8   : > { %s585_s15 = sadd.s32 1, %s543_s12   ;;  %s28_s16 = sadd.s32 1, %s539_s11 }
   0x9   : > { %s25_s17 = ssub.s32 %s543_s12, %s585_s15  ;;  %p35_p0 = scmp.ne.s32.totalorder %s539_s11, %s535_s10 }
   0xa   : > { %p26_p1 = scmp.eq.s32.totalorder %s25_s17, 0  ;;  %p36_p2 = scmp.eq.s32.totalorder %s543_s12, 0 }
   0xb   : > { %p41_p3 = scmp.ne.s32.totalorder %s535_s10, %s531_s9  ;;  %p42_p4 = scmp.eq.s32.totalorder %s581_s13, 0 }
   0xc   : > { %s597_s18 = scalar_select %p26_p1, %s539_s11, %s28_s16  }
   0xd   : > { %p599_p5 = por %p36_p2, %p35_p0  ;;  %p603_p6 = por %p42_p4, %p41_p3 }
   0xe   : > { %p91_p7 = scmp.eq.s32.totalorder %s581_s13, 1  ;;  %p97_p8 = scmp.eq.s32.totalorder %s343_s14, 1 }
   0xf   : > { %p379_p10 = scmp.lt.s32.totalorder %s543_s12, 2  ;;  %s619_s23 = sand.u32 1, %s539_s11  }
  0x10   : > { %p610_p11 = por %p91_p7, %p35_p0  ;;  %p614_p12 = por %p97_p8, %p41_p3 }
  0x11   : > { %s360_s24 = sshll.u32 %s543_s12, 5  ;;  %s346_s25 = sshll.u32 %s619_s23, 5 }
  0x12   : > { %s126_s28 = scalar_lea.hbm %s721_s0, %s360_s24  ;;  %s121_s30 = scalar_lea.vmem [#allocation2], %s346_s25 }
  0x13   : > { %s128_s29 = sshll.u32 %s126_s28, 4  ;;  %s130_s3 = sshll.u32 %s121_s30, 4  ;;  %s129_s29 = int_to_ptr.hbm [resolvable:$true] %s128_s29  ;;  %s131_s3 = int_to_ptr.vmem [resolvable:$true] %s130_s3 }
  0x14   : > { %p628_p13 = pnand %p379_p10, %p599_p5  ;;  %p352_p0 = scmp.ge.s32.totalorder %s543_s12, 1 }
  0x15   : > { %p155_p1 = scmp.lt.s32.totalorder %s543_s12, 3  ;;  %s118_s5 = scalar_lea.sflag [#allocation3], %s619_s23 }
  0x16   : > { %s413_s6 = sshra.s32 %s129_s29, 4  ;;  %p417_p3 = pneg %p628_p13  ;;  %s414_s6 = int_to_ptr.hbm [resolvable:$true] %s413_s6 }
  0x17   : > { %s415_s7 = scalar_lea.hbm %s414_s6, 32  ;;  %s420_s16 = scalar_lea.hbm %s721_s0, 64 }
  0x18   : > { %p416_p2 = scmp.ne.s32.totalorder %s414_s6, %s415_s7  ;;  %p421_p5 = scmp.lt.s32.totalorder %s414_s6, %s721_s0 }
  0x19   : > { %p422_p8 = scmp.lt.s32.totalorder %s420_s16, %s415_s7 }
  0x1a   : > { %p418_p4 = pnand %p417_p3, %p416_p2 }
  0x1b   : > { %p423_p10 = por %p422_p8, %p421_p5 }
  0x1c   : > { %p419_p7 = pneg %p418_p4 }
  0x1e   : > { %p424_p9 = pnand %p423_p10, %p419_p7 }
  0x20   : > { %427 = shalt.err (!%p424_p9)
}
  0x21   : > { %371 = dma.hbm_to_vmem [thread:$0]  (!%p628_p13), %s129_s29, 512, %s131_s3, %s118_s5  }
  0x22   : > { %p652_p2 = pnand %p352_p0, %p155_p1  ;;  %s146_s30 = scalar_lea.hbm %s722_s1, %s360_s24 }
  0x23   : > { %s148_s6 = sshll.u32 %s146_s30, 4  ;;  %s141_s7 = scalar_lea.vmem [#allocation5], %s346_s25  ;;  %s149_s6 = int_to_ptr.hbm [resolvable:$true] %s148_s6 }
  0x24   : > { %s150_s8 = sshll.u32 %s141_s7, 4  ;;  %s138_s14 = scalar_lea.sflag [#allocation6], %s619_s23  ;;  %s151_s8 = int_to_ptr.vmem [resolvable:$true] %s150_s8 }
  0x25   : > { %s443_s16 = sshra.s32 %s149_s6, 4  ;;  %s450_s5 = scalar_lea.hbm %s722_s1, 64  ;;  %s444_s16 = int_to_ptr.hbm [resolvable:$true] %s443_s16 }
  0x26   : > { %s445_s17 = scalar_lea.hbm %s444_s16, 32  ;;  %p451_p4 = scmp.lt.s32.totalorder %s444_s16, %s722_s1 }
  0x27   : > { %p446_p9 = scmp.ne.s32.totalorder %s444_s16, %s445_s17  ;;  %p452_p7 = scmp.lt.s32.totalorder %s450_s5, %s445_s17 }
  0x29   : > { %p448_p0 = pnand %p446_p9, %p417_p3  ;;  %p453_p5 = por %p452_p7, %p451_p4 }
  0x2b   : > { %p449_p1 = pneg %p448_p0 }
  0x2d   : > { %p454_p8 = pnand %p453_p5, %p449_p1 }
  0x2f   : > { %457 = shalt.err (!%p454_p8)
}
  0x30   : > { %374 = dma.hbm_to_vmem [thread:$0]  (!%p628_p13), %s149_s6, 512, %s151_s8, %s138_s14  }
  0x31   : > { %159 = sbr.rel (%p652_p2) target bundleno = 75 (0x4b), region = 28  ;;  %s674_s23 = sand.u32 (!%p652_p2), 1, %s535_s10  }
  0x32   : > { %s353_s25 = sshll.u32 (!%p652_p2), %s674_s23, 5  ;;  %s162_s27 = scalar_lea.sflag (!%p652_p2), [#allocation3], %s674_s23 }
  0x33   : > { %s165_s28 = scalar_lea.vmem (!%p652_p2), [#allocation2], %s353_s25 }
  0x36   : > { %518 = dma.done.wait (%p603_p6), %s162_s27, 512  }
  0x37   : > { %520 = vsyncadd (%p603_p6), %s162_s27, 4294966784  ;;  %s172_s4 = scalar_lea.sflag [#allocation6], %s674_s23  ;;  %s175_s30 = scalar_lea.vmem [#allocation5], %s353_s25 }
  0x38   : > { %522 = dma.done.wait (%p603_p6), %s172_s4, 512  }
  0x39   : > { %524 = vsyncadd (%p603_p6), %s172_s4, 4294966784  ;;  %v202_v0 = vld [vmem:[%s165_s28] sm:$0xff]  ;;  %v203_v1 = vld [vmem:[%s165_s28 + $0x8] sm:$0xff]  ;;  %s355_s26 = sshll.u32 %s674_s23, 3  ;;  %s357_s20 = sshll.u32 %s581_s13, 3 }
  0x3a   : > { %v204_v2 = vld [vmem:[%s165_s28 + $0x10] sm:$0xff]  ;;  %v205_v3 = vld [vmem:[%s165_s28 + $0x18] sm:$0xff]  ;;  %v206_v4 = vmul.f32 2.0, %v202_v0  ;;  %v207_v5 = vmul.f32 2.0, %v203_v1  ;;  %v214_v8 = vld [vmem:[%s175_s30] sm:$0xff]  ;;  %s245_s8 = scalar_lea.hbm %s723_s2, %s357_s20  ;;  %s201_s14 = scalar_lea.vmem [#allocation7], %s355_s26 }
  0x3b   : > { %v208_v6 = vmul.f32 2.0, %v204_v2  ;;  %v209_v7 = vmul.f32 2.0, %v205_v3  ;;  %v215_v9 = vld [vmem:[%s175_s30 + $0x8] sm:$0xff]  ;;  %v216_v10 = vld [vmem:[%s175_s30 + $0x10] sm:$0xff]  ;;  %v217_v14 = vld [vmem:[%s175_s30 + $0x18] sm:$0xff]  ;;  %s247_s16 = sshll.u32 %s201_s14, 4  ;;  %s248_s16 = int_to_ptr.vmem [resolvable:$true] %s247_s16 }
  0x3c   : > { %v210_v11 = vadd.f32 0.5, %v206_v4  ;;  %v211_v12 = vadd.f32 0.5, %v207_v5  ;;  %s249_s17 = sshll.u32 %s245_s8, 4  ;;  %s235_s13 = scalar_lea.sflag [#allocation4], %s674_s23  ;;  %s250_s17 = int_to_ptr.hbm [resolvable:$true] %s249_s17 }
  0x3d   : > { %v212_v13 = vadd.f32 0.5, %v208_v6  ;;  %v213_v15 = vadd.f32 0.5, %v209_v7  ;;  %s487_s29 = sshra.s32 %s250_s17, 4  ;;  %s493_s24 = scalar_lea.hbm %s723_s2, 16  ;;  %s488_s29 = int_to_ptr.hbm [resolvable:$true] %s487_s29 }
  0x3e   : > { %v218_v16 = vsub.f32 %v210_v11, %v214_v8  ;;  %v219_v17 = vsub.f32 %v211_v12, %v215_v9  ;;  %s489_s3 = scalar_lea.hbm %s488_s29, 8  ;;  %p494_p10 = scmp.lt.s32.totalorder %s488_s29, %s723_s2 }
  0x3f   : > { %v220_v18 = vsub.f32 %v212_v13, %v216_v10  ;;  %v221_v19 = vsub.f32 %v213_v15, %v217_v14  ;;  %p490_p6 = scmp.ne.s32.totalorder %s488_s29, %s489_s3  ;;  %p495_p2 = scmp.lt.s32.totalorder %s493_s24, %s489_s3 }
  0x40   : > { %v222_v20 = vand.u32 2147483647, %v218_v16  ;;  %v223_v21 = vand.u32 2147483647, %v219_v17 }
  0x41   : > { %v224_v22 = vand.u32 2147483647, %v220_v18  ;;  %v225_v23 = vand.u32 2147483647, %v221_v19  ;;  %p491_p13 = pnand %p490_p6, %p610_p11  ;;  %p496_p9 = por %p495_p2, %p494_p10 }
  0x42   : > { %v230_v24 = vadd.f32 %v223_v21, %v222_v20 }
  0x43   : > { %p492_p3 = pneg %p491_p13 }
  0x44   : > { %v231_v25 = vadd.f32 %v230_v24, %v224_v22 }
  0x45   : > { %p497_p0 = pnand %p496_p9, %p492_p3 }
  0x46   : > { %v232_v26 = vadd.f32 %v231_v25, %v225_v23 }
  0x48   : > { %233 = vst [vmem:[%s201_s14] sm:$0xff] %v232_v26 }
  0x49   : > { %500 = shalt.err (!%p497_p0)
}
  0x4a   : > { %366 = dma.vmem_to_hbm [thread:$0]  (%p610_p11), %s248_s16, 128, %s250_s17, %s235_s13  }
  0x4b PF: > { %s261_s23 = sand.u32 1, %s531_s9   ;;  %p730_p1 = scmp.ge.s32.totalorder %s543_s12, 2 }
  0x4c   : > { %s262_s28 = scalar_lea.sflag [#allocation4], %s261_s23 }
  0x4d   : > { %p376_p4 = pnand %p730_p1, %p614_p12 }
  0x4f   : > { %p377_p7 = pneg %p376_p4 }
  0x51   : > { %526 = dma.done.wait (%p377_p7), %s262_s28, 128  }
  0x52   : > { %528 = vsyncadd (%p377_p7), %s262_s28, 4294967168  ;;  %p18_p5 = scmp.ge.s32.totalorder %s585_s15, 4   ;;  %s731_s9 = smov %s535_s10 }
  0x53   : > { %s732_s10 = smov %s539_s11  ;;  %s733_s11 = smov %s597_s18 }
  0x54   : > { %s734_s12 = smov %s585_s15  ;;  %20 = sbr.rel (!%p18_p5) target bundleno = 7 (0x7), region = 86 }
  0x59   :  { %268 = vsyncpa [#allocation3], 1 }
  0x5a   :  { %270 = vsyncpa [#allocation3 + $0x1], 1 }
  0x5b   :  { %271 = vsyncpa [#allocation6], 1 }
  0x5c   :  { %273 = vsyncpa [#allocation6 + $0x1], 1 }
  0x5d   :  { %274 = vsyncpa [#allocation4], 1 }
  0x5e   :  { %276 = vsyncpa [#allocation4 + $0x1], 1 }

</bundles_post_ra>
